<compile_context>
chip_gen: v7x
topology: tpu7x:2x2x1
jax: 0.10.0
libtpu: 0.0.40
codegen_flags: <defaults>
</compile_context>

<pallas_src>
import functools

import jax
import jax.numpy as jnp
from jax.experimental import pallas as pl
from jax.experimental.pallas import tpu as pltpu


# ---------------------------------------------------------------------------
# Kernels (bf16 MXU matmul, f32 accumulation)
# ---------------------------------------------------------------------------
def _kernel_f32out_bias(x_ref, w_ref, b_ref, o_ref):
    k = pl.program_id(2)

    @pl.when(k == 0)
    def _():
        o_ref[...] = jnp.zeros_like(o_ref)

    o_ref[...] += jnp.dot(x_ref[...].astype(jnp.bfloat16), w_ref[...],
                          preferred_element_type=jnp.float32)

    @pl.when(k == pl.num_programs(2) - 1)
    def _():
        o_ref[...] += b_ref[...].astype(jnp.float32)


def _kernel_f32out_nobias(x_ref, w_ref, o_ref):
    k = pl.program_id(2)

    @pl.when(k == 0)
    def _():
        o_ref[...] = jnp.zeros_like(o_ref)

    o_ref[...] += jnp.dot(x_ref[...].astype(jnp.bfloat16), w_ref[...],
                          preferred_element_type=jnp.float32)


def _kernel_castout_bias(x_ref, w_ref, b_ref, o_ref, acc_ref):
    k = pl.program_id(2)

    @pl.when(k == 0)
    def _():
        acc_ref[...] = jnp.zeros_like(acc_ref)

    acc_ref[...] += jnp.dot(x_ref[...].astype(jnp.bfloat16), w_ref[...],
                            preferred_element_type=jnp.float32)

    @pl.when(k == pl.num_programs(2) - 1)
    def _():
        o_ref[...] = (acc_ref[...] + b_ref[...].astype(jnp.float32)
                      ).astype(o_ref.dtype)


def _kernel_castout_nobias(x_ref, w_ref, o_ref, acc_ref):
    k = pl.program_id(2)

    @pl.when(k == 0)
    def _():
        acc_ref[...] = jnp.zeros_like(acc_ref)

    acc_ref[...] += jnp.dot(x_ref[...].astype(jnp.bfloat16), w_ref[...],
                            preferred_element_type=jnp.float32)

    @pl.when(k == pl.num_programs(2) - 1)
    def _():
        o_ref[...] = acc_ref[...].astype(o_ref.dtype)


# ---------------------------------------------------------------------------
# Tiling / wrapper
# ---------------------------------------------------------------------------
def _round_up(x, m):
    return (x + m - 1) // m * m


_TM_CAP = 512     # M tile cap (sublane axis)
_TN_CAP = 512     # N tile cap (lane axis; multiple of 256 for v6e/v7x MXU)
_TK_CAP = 1024    # K tile cap (large to dilute the acc/output RMW per flop)


def _pick_tiles(M, K, N, x_dtype):
    # dtype-aware sublane rounding: f32 packs 8 rows / vreg, bf16 16, 8-bit 32
    sub = {4: 8, 2: 16, 1: 32}.get(jnp.dtype(x_dtype).itemsize, 8)

    tm = min(_TM_CAP, _round_up(M, sub))
    # Full-dim K / N blocks when they fit: exempt from the 128-lane rule and
    # require no per-call jnp.pad HBM copies for common shapes.
    tk = K if K <= _TK_CAP else _TK_CAP
    tn = N if N <= _TN_CAP else _TN_CAP

    # Keep >= 2 (M, N) tiles when possible so both v7x TensorCores get work
    # under ("parallel", "parallel", "arbitrary").
    if pl.cdiv(M, tm) * pl.cdiv(N, tn) < 2:
        if M >= 2 * sub:
            tm = _round_up(pl.cdiv(M, 2), sub)
        elif N >= 256:
            tn = _round_up(pl.cdiv(N, 2), 128)
    return tm, tk, tn


def _vmem_limit_bytes(tm, tk, tn, x_item, o_item, has_bias, use_scratch):
    need = 2 * (tm * tk * x_item           # x tiles (double-buffered)
                + tk * tn * 2              # bf16 W tiles (double-buffered)
                + tm * tn * o_item         # output tiles (double-buffered)
                + (tn * 4 if has_bias else 0))
    if use_scratch:
        need += tm * tn * 4
    # 50% headroom, 32 MiB floor, stay well under v7x's 64 MiB physical VMEM.
    return int(min(max(need * 3 // 2, 32 * 1024 * 1024), 56 * 1024 * 1024))


@functools.partial(jax.jit, static_argnames=("has_bias",))
def _linear_pallas_2d(x2d, w_kn, bias, has_bias):
    M, K = x2d.shape
    _, N = w_kn.shape
    out_dtype = x2d.dtype
    use_scratch = out_dtype != jnp.float32   # f32 out -> accumulate in o_ref

    tm, tk, tn = _pick_tiles(M, K, N, x2d.dtype)
    Mp, Kp, Np = _round_up(M, tm), _round_up(K, tk), _round_up(N, tn)

    # Weight lives in HBM as bf16 (pre-cast at init; this astype is a no-op
    # then).  Pads below are statically dead for already-aligned shapes.
    wp = w_kn if w_kn.dtype == jnp.bfloat16 else w_kn.astype(jnp.bfloat16)
    xp = x2d
    if Mp != M or Kp != K:
        xp = jnp.pad(xp, ((0, Mp - M), (0, Kp - K)))
    if Kp != K or Np != N:
        wp = jnp.pad(wp, ((0, Kp - K), (0, Np - N)))

    grid = (Mp // tm, Np // tn, Kp // tk)

    in_specs = [
        pl.BlockSpec((tm, tk), lambda i, j, k: (i, k)),   # x
        pl.BlockSpec((tk, tn), lambda i, j, k: (k, j)),   # W pre-transposed (K,N)
    ]
    operands = [xp, wp]

    if has_bias:
        bp = bias.reshape(1, N).astype(jnp.float32)
        if Np != N:
            bp = jnp.pad(bp, ((0, 0), (0, Np - N)))
        in_specs.append(pl.BlockSpec((1, tn), lambda i, j, k: (0, j)))
        operands.append(bp)
        kernel = _kernel_castout_bias if use_scratch else _kernel_f32out_bias
    else:
        kernel = _kernel_castout_nobias if use_scratch else _kernel_f32out_nobias

    scratch_shapes = [pltpu.VMEM((tm, tn), jnp.float32)] if use_scratch else []

    o_item = jnp.dtype(out_dtype).itemsize
    cost = pl.CostEstimate(
        flops=2 * M * N * K,
        transcendentals=0,
        bytes_accessed=(M * K * x2d.dtype.itemsize + K * N * 2
                        + (N * 4 if has_bias else 0) + M * N * o_item))

    out = pl.pallas_call(
        kernel,
        out_shape=jax.ShapeDtypeStruct((Mp, Np), out_dtype),
        grid_spec=pltpu.PrefetchScalarGridSpec(
            num_scalar_prefetch=0,
            grid=grid,
            in_specs=in_specs,
            out_specs=pl.BlockSpec((tm, tn), lambda i, j, k: (i, j)),
            scratch_shapes=scratch_shapes,
        ),
        compiler_params=pltpu.CompilerParams(
            dimension_semantics=("parallel", "parallel", "arbitrary"),
            vmem_limit_bytes=_vmem_limit_bytes(
                tm, tk, tn, x2d.dtype.itemsize, o_item, has_bias, use_scratch)),
        cost_estimate=cost,
    )(*operands)

    if Mp != M or Np != N:
        out = out[:M, :N]
    return out


def linear_pallas(x, w_kn, bias=None):
    """y = x @ w_kn + bias  ==  torch nn.Linear with weight = w_kn.T.

    x:    (..., K)          any float dtype (output dtype follows x)
    w_kn: (K, N)  bf16      nn.Linear weight stored PRE-TRANSPOSED + pre-cast
    bias: (N,) f32 or None
    """
    *lead, K = x.shape
    N = w_kn.shape[1]
    M = 1
    for d in lead:
        M *= d
    x2d = x.reshape(M, K)
    has_bias = bias is not None
    b_arg = bias if has_bias else jnp.zeros((0,), jnp.float32)
    out = _linear_pallas_2d(x2d, w_kn, b_arg, has_bias)
    return out.reshape(*lead, N)


# ---------------------------------------------------------------------------
# Parameter init (matches nn.init.xavier_normal_ + zero bias).  Weight is
# stored pre-transposed (K, N) and pre-cast to bf16 at init so the per-call
# path has no transpose / cast / pad HBM copies.
# ---------------------------------------------------------------------------
def init_linear_params(key, in_channels, out_channels, bias=True):
    # xavier_normal_: std = sqrt(2 / (fan_in + fan_out)); symmetric in fans.
    std = (2.0 / (in_channels + out_channels)) ** 0.5
    w_kn = (std * jax.random.normal(key, (in_channels, out_channels),
                                    jnp.float32)).astype(jnp.bfloat16)
    b = jnp.zeros((out_channels,), jnp.float32) if bias else None
    return w_kn, b


# ---------------------------------------------------------------------------
# Demo / self-test
# ---------------------------------------------------------------------------
if __name__ == "__main__":
    key = jax.random.PRNGKey(0)
    k_x, k_w = jax.random.split(key)

    batch, seq, in_ch, out_ch = 2, 8, 32, 64
    x = jax.random.normal(k_x, (batch, seq, in_ch), jnp.float32)
    w_kn, bias = init_linear_params(k_w, in_ch, out_ch, bias=True)

    # With bias
    y = linear_pallas(x, w_kn, bias)
    jax.block_until_ready(y)
    assert y.shape == (batch, seq, out_ch)
    assert y.dtype == jnp.float32

    # Reference: same bf16-rounded operands, full-precision f32 accumulation.
    y_ref = jnp.dot(x.astype(jnp.bfloat16).astype(jnp.float32),
                    w_kn.astype(jnp.float32),
                    precision=jax.lax.Precision.HIGHEST) + bias
    assert jnp.allclose(y, y_ref, atol=1e-3, rtol=1e-3)

    # Without bias (separate kernel path, no zeros materialized)
    y_nb = linear_pallas(x, w_kn, None)
    jax.block_until_ready(y_nb)
    assert jnp.allclose(y_nb, y_ref - bias, atol=1e-3, rtol=1e-3)

    print("KERNEL_OK")
</pallas_src>

<mosaic_0001>
module attributes {stable_mosaic.version = 11 : i64} {
  func.func @_kernel_f32out_bias(%arg0: i32, %arg1: i32, %arg2: i32, %arg3: memref<8x32xf32, #tpu.memory_space<vmem>>, %arg4: memref<32x64xbf16, #tpu.memory_space<vmem>>, %arg5: memref<1x64xf32, #tpu.memory_space<vmem>>, %arg6: memref<8x64xf32, #tpu.memory_space<vmem>>) attributes {dimension_semantics = [#tpu.dimension_semantics<parallel>, #tpu.dimension_semantics<parallel>, #tpu.dimension_semantics<arbitrary>], iteration_bounds = array<i64: 2, 1, 1>, scalar_prefetch = 0 : i64, scratch_operands = 0 : i64, tpu.core_type = #tpu.core_type<tc>, window_params = [{transform_indices = @transform_0, window_bounds = array<i64: 8, 32>}, {transform_indices = @transform_1, window_bounds = array<i64: 32, 64>}, {transform_indices = @transform_2, window_bounds = array<i64: 1, 64>}, {transform_indices = @transform_3, window_bounds = array<i64: 8, 64>}]} {
    %c0_i32 = arith.constant 0 : i32
    %0 = arith.cmpi eq, %arg2, %c0_i32 : i32
    %1 = arith.extui %0 : i1 to i32
    %c0_i32_0 = arith.constant 0 : i32
    %2 = arith.cmpi ne, %1, %c0_i32_0 : i32
    scf.if %2 {
      %cst_10 = arith.constant 0.000000e+00 : f32
      %13 = vector.broadcast %cst_10 : f32 to vector<8x64xf32>
      %c0_11 = arith.constant 0 : index
      %c0_12 = arith.constant 0 : index
      %14 = vector.load %arg6[%c0_11, %c0_12] : memref<8x64xf32, #tpu.memory_space<vmem>>, vector<8x64xf32>
      tpu.vector_store %arg6[%c0_11, %c0_12], %13 {strides = array<i32>} : memref<8x64xf32, #tpu.memory_space<vmem>>, vector<8x64xf32>,
    } else {
    }
    %c0 = arith.constant 0 : index
    %c0_1 = arith.constant 0 : index
    %3 = vector.load %arg6[%c0, %c0_1] : memref<8x64xf32, #tpu.memory_space<vmem>>, vector<8x64xf32>
    %c0_2 = arith.constant 0 : index
    %c0_3 = arith.constant 0 : index
    %4 = vector.load %arg3[%c0_2, %c0_3] : memref<8x32xf32, #tpu.memory_space<vmem>>, vector<8x32xf32>
    %5 = arith.truncf %4 : vector<8x32xf32> to vector<8x32xbf16>
    %c0_4 = arith.constant 0 : index
    %c0_5 = arith.constant 0 : index
    %6 = vector.load %arg4[%c0_4, %c0_5] : memref<32x64xbf16, #tpu.memory_space<vmem>>, vector<32x64xbf16>
    %cst = arith.constant dense<0.000000e+00> : vector<8x64xf32>
    %7 = tpu.matmul %5, %6, %cst {dimension_numbers = #tpu.dot_dimension_numbers<[1], [0], [0], [1], [0, 0, 1, 1], [], []>} : vector<8x32xbf16>, vector<32x64xbf16>, vector<8x64xf32> -> vector<8x64xf32>
    %8 = arith.addf %3, %7 : vector<8x64xf32>
    %c0_6 = arith.constant 0 : index
    %c0_7 = arith.constant 0 : index
    %9 = vector.load %arg6[%c0_6, %c0_7] : memref<8x64xf32, #tpu.memory_space<vmem>>, vector<8x64xf32>
    tpu.vector_store %arg6[%c0_6, %c0_7], %8 {strides = array<i32>} : memref<8x64xf32, #tpu.memory_space<vmem>>, vector<8x64xf32>,
    %c0_i32_8 = arith.constant 0 : i32
    %10 = arith.cmpi eq, %arg2, %c0_i32_8 : i32
    %11 = arith.extui %10 : i1 to i32
    %c0_i32_9 = arith.constant 0 : i32
    %12 = arith.cmpi ne, %11, %c0_i32_9 : i32
    scf.if %12 {
      %c0_10 = arith.constant 0 : index
      %c0_11 = arith.constant 0 : index
      %13 = vector.load %arg6[%c0_10, %c0_11] : memref<8x64xf32, #tpu.memory_space<vmem>>, vector<8x64xf32>
      %c0_12 = arith.constant 0 : index
      %c0_13 = arith.constant 0 : index
      %14 = vector.load %arg5[%c0_12, %c0_13] : memref<1x64xf32, #tpu.memory_space<vmem>>, vector<1x64xf32>
      %15 = vector.broadcast %14 : vector<1x64xf32> to vector<8x64xf32>
      %16 = arith.addf %13, %15 : vector<8x64xf32>
      %c0_14 = arith.constant 0 : index
      %c0_15 = arith.constant 0 : index
      %17 = vector.load %arg6[%c0_14, %c0_15] : memref<8x64xf32, #tpu.memory_space<vmem>>, vector<8x64xf32>
      tpu.vector_store %arg6[%c0_14, %c0_15], %16 {strides = array<i32>} : memref<8x64xf32, #tpu.memory_space<vmem>>, vector<8x64xf32>,
    } else {
    }
    return
  }
  func.func @transform_0(%arg0: i32, %arg1: i32, %arg2: i32) -> (i32, i32) {
    %c0_i32 = arith.constant 0 : i32
    return %arg0, %arg2 : i32, i32
  }
  func.func @transform_1(%arg0: i32, %arg1: i32, %arg2: i32) -> (i32, i32) {
    %c0_i32 = arith.constant 0 : i32
    return %arg2, %arg1 : i32, i32
  }
  func.func @transform_2(%arg0: i32, %arg1: i32, %arg2: i32) -> (i32, i32) {
    %c0_i32 = arith.constant 0 : i32
    %c0_i32_0 = arith.constant 0 : i32
    return %c0_i32, %arg1 : i32, i32
  }
  func.func @transform_3(%arg0: i32, %arg1: i32, %arg2: i32) -> (i32, i32) {
    %c0_i32 = arith.constant 0 : i32
    return %arg0, %arg1 : i32, i32
  }
}

</mosaic_0001>

<bundles_post_ra>
// kernel: _linear_pallas_2d.1
= control target key start
LH: loop header
LB: loop body
LE: loop exit
PB: predicated region body
PF: predicated region fallthrough
CT: control target
= control target key end

     0   :  { %8 = vsyncpa [#allocation3], 0  ;;  %s964_s0 = inlined_call_operand.hbm [shape: f32[16,32], index: 0, kind: input, shape index: {}]   ;;  %s965_s1 = inlined_call_operand.hbm [shape: bf16[32,64], index: 1, kind: input, shape index: {}]   ;;  %s966_s2 = inlined_call_operand.vmem [shape: f32[1,64], index: 2, kind: input, shape index: {}]   ;;  %s967_s3 = inlined_call_operand.hbm [shape: f32[16,64], index: 3, kind: output, shape index: {}]  }
   0x1   :  { %10 = vsyncpa [#allocation3 + $0x1], 0 }
   0x2   :  { %11 = vsyncpa [#allocation6], 0 }
   0x3   :  { %12 = vsyncpa [#allocation4], 0 }
   0x4   :  { %14 = vsyncpa [#allocation4 + $0x1], 0  ;;  %s744_s12 = smov 0   ;;  %s746_s13 = smov 0  }
   0x5   :  { %s748_s14 = smov 0   ;;  %s750_s15 = smov 0  }
   0x6   :  { %s752_s16 = smov 0   ;;  %s754_s17 = smov 0  }
   0x7 LB: > { %s461_s18 = sadd.s32 4294967295, %s715_s17   ;;  %s462_s19 = sadd.s32 4294967294, %s715_s17   ;;  %s715_s17 = sphi %s754_s17, %s20_s17   ;;  %s711_s16 = sphi %s752_s16, %s991_s16   ;;  %s707_s15 = sphi %s750_s15, %s990_s15   ;;  %s703_s14 = sphi %s748_s14, %s989_s14   ;;  %s699_s13 = sphi %s746_s13, %s988_s13   ;;  %s695_s12 = sphi %s744_s12, %s987_s12  }
   0x8   : > { %p61_p0 = scmp.ne.s32.totalorder %s699_s13, %s695_s12  ;;  %p778_p1 = scmp.eq.s32.totalorder %s461_s18, 0 }
   0x9   : > { %p782_p2 = scmp.eq.s32.totalorder %s461_s18, 1  ;;  %p147_p3 = scmp.eq.s32.totalorder %s462_s19, 1 }
   0xa   : > { %s972_s20 = scalar_select %p778_p1, 1, 0 }
   0xb   : > { %s973_s21 = scalar_select %p782_p2, 1, 0 }
   0xc   : > { %p788_p4 = por %p778_p1, %p61_p0  ;;  %p463_p5 = scmp.ge.s32.totalorder %s715_s17, 1 }
   0xd   : > { %p793_p6 = por %p147_p3, %p61_p0  ;;  %p154_p7 = scmp.lt.s32.totalorder %s715_s17, 3 }
   0xe   : > { %s974_s22 = scalar_select %p788_p4, 1, 0 }
   0xf   : > { %s975_s23 = scalar_select %p793_p6, 1, 0 }
  0x10   : > { %p798_p8 = pnand %p463_p5, %p154_p7  ;;  %s717_s25 = smov [#allocation5]  }
  0x11   : > { %s170_s26 = sshll.u32 %s717_s25, 4  ;;  %s39_s28 = sadd.s32 1, %s711_s16  ;;  %s171_s26 = int_to_ptr.vmem [resolvable:$true] %s170_s26 }
  0x12   : > { %s976_s24 = scalar_select %p798_p8, 1, 0 }
  0x13   : > { %p500_p9 = pneg %p798_p8  ;;  %s571_s4 = scalar_lea.hbm %s965_s1, 256 }
  0x14   : > { %p572_p12 = scmp.ne.s32.totalorder %s965_s1, %s571_s4  ;;  %p578_p5 = scmp.lt.u32.totalorder %s571_s4, %s965_s1 }
  0x15   : > { %p807_p11 = pnand %p500_p9, %p778_p1 }
  0x17   : > { %p573_p13 = pneg %p807_p11 }
  0x19   : > { %p574_p0 = pnand %p573_p13, %p572_p12 }
  0x1b   : > { %p575_p3 = pneg %p574_p0 }
  0x1d   : > { %p580_p7 = pnand %p578_p5, %p575_p3 }
  0x1f   : > { %583 = shalt.err (!%p580_p7)
}
  0x20   : > { %s584_s9 = scalar_lea.vmem %s171_s26, 256  ;;  %p592_p1 = scmp.lt.s32.totalorder %s171_s26, %s171_s26 }
  0x21   : > { %p585_p9 = scmp.ne.s32.totalorder %s171_s26, %s584_s9  ;;  %p593_p4 = scmp.lt.s32.totalorder %s584_s9, %s584_s9 }
  0x23   : > { %p587_p10 = pnand %p585_p9, %p573_p13  ;;  %p594_p8 = por %p593_p4, %p592_p1 }
  0x25   : > { %p588_p6 = pneg %p587_p10 }
  0x27   : > { %p595_p2 = pnand %p594_p8, %p588_p6 }
  0x29   : > { %598 = shalt.err (!%p595_p2)
}
  0x2a   : > { %s718_s10 = smov 64   ;;  %s719_s11 = smov 4  }
  0x2b   : > { %503 = dma.hbm_to_vmem [thread:$0]  (!%p807_p11), %s965_s1, 256, %s171_s26, [#allocation6], %s718_s10, %s718_s10, %s719_s11  }
  0x2c   : > { %p41_p1 = scmp.ge.s32.totalorder %s39_s28, 2  ;;  %s48_s25 = sadd.s32 1, %s703_s14 }
  0x2d   : > { %p55_p2 = scmp.ne.s32.totalorder %s703_s14, %s699_s13  ;;  %p56_p4 = scmp.eq.s32.totalorder %s715_s17, 0 }
  0x2e   : > { %s993_s28 = smov (%p41_p1, %s39_s28), 0  ;;  %p979_p8 = scmp.ne.s32.totalorder %s973_s21, 0 }
  0x2f   : > { %p834_p6 = por %p56_p4, %p55_p2  ;;  %s43_s27 = ssub.s32 %s711_s16, %s993_s28 }
  0x30   : > { %p840_p10 = por %p979_p8, %p55_p2  ;;  %p513_p12 = scmp.lt.s32.totalorder %s715_s17, 2 }
  0x31   : > { %p46_p11 = scmp.eq.s32.totalorder %s43_s27, 0  ;;  %s190_s26 = sand.u32 1, %s703_s14  }
  0x32   : > { %s467_s4 = sshll.u32 %s190_s26, 3  ;;  %s468_s6 = sshll.u32 %s711_s16, 7 }
  0x33   : > { %s849_s5 = scalar_select %p46_p11, %s703_s14, %s48_s25  }
  0x34   : > { %s855_s9 = scalar_lea.hbm %s964_s0, %s468_s6  ;;  %s194_s21 = scalar_lea.vmem [#allocation2], %s467_s4 }
  0x35   : > { %s202_s10 = sshll.u32 %s194_s21, 4  ;;  %p861_p13 = pnand %p513_p12, %p834_p6  ;;  %s857_s10 = int_to_ptr.vmem [resolvable:$true] %s202_s10 }
  0x36   : > { %s191_s18 = scalar_lea.sflag [#allocation3], %s190_s26  ;;  %s599_s19 = scalar_lea.hbm %s855_s9, 128 }
  0x37   : > { %p600_p0 = scmp.ne.s32.totalorder %s855_s9, %s599_s19  ;;  %p601_p3 = pneg %p861_p13 }
  0x38   : > { %s604_s4 = scalar_lea.hbm %s964_s0, 256  ;;  %p605_p9 = scmp.lt.u32.totalorder %s855_s9, %s964_s0 }
  0x39   : > { %p602_p5 = pnand %p601_p3, %p600_p0  ;;  %p606_p1 = scmp.lt.u32.totalorder %s604_s4, %s599_s19 }
  0x3a   : > { %p608_p4 = scmp.lt.u32.totalorder %s599_s19, %s855_s9 }
  0x3b   : > { %p603_p7 = pneg %p602_p5  ;;  %p607_p2 = por %p606_p1, %p605_p9 }
  0x3d   : > { %p609_p6 = por %p608_p4, %p607_p2 }
  0x3f   : > { %p610_p8 = pnand %p609_p6, %p603_p7 }
  0x41   : > { %613 = shalt.err (!%p610_p8)
}
  0x42   : > { %s614_s26 = scalar_lea.vmem %s857_s10, 128  ;;  %s720_s7 = smov [#allocation2]  }
  0x43   : > { %p615_p12 = scmp.ne.s32.totalorder %s857_s10, %s614_s26  ;;  %s619_s8 = sshll.u32 %s720_s7, 4  ;;  %s620_s8 = int_to_ptr.vmem [resolvable:$false] %s619_s8 }
  0x44   : > { %s621_s21 = scalar_lea.vmem %s620_s8, 256  ;;  %p622_p5 = scmp.lt.s32.totalorder %s857_s10, %s620_s8 }
  0x45   : > { %p617_p11 = pnand %p615_p12, %p601_p3  ;;  %p623_p9 = scmp.lt.s32.totalorder %s621_s21, %s614_s26 }
  0x47   : > { %p618_p0 = pneg %p617_p11  ;;  %p624_p1 = por %p623_p9, %p622_p5 }
  0x49   : > { %p625_p2 = pnand %p624_p1, %p618_p0 }
  0x4b   : > { %628 = shalt.err (!%p625_p2)
}
  0x4c   : > { %507 = dma.hbm_to_vmem [thread:$0]  (!%p861_p13), %s855_s9, 128, %s857_s10, %s191_s18  }
  0x4d   : > { %p982_p7 = scmp.ne.s32.totalorder %s976_s24, 0 }
  0x4e   : > { %s893_s19 = sand.u32 (!%p982_p7), 1, %s699_s13   ;;  %p983_p3 = scmp.ne.s32.totalorder (!%p982_p7), %s974_s22, 0 }
  0x4f   : > { %211 = sbr.rel (%p982_p7) target bundleno = 337 (0x151), region = 32  ;;  %s470_s25 = sshll.u32 (!%p982_p7), %s893_s19, 3 }
  0x50   : > { %s214_s27 = scalar_lea.sflag (!%p982_p7), [#allocation3], %s893_s19  ;;  %s217_s4 = scalar_lea.vmem (!%p982_p7), [#allocation2], %s470_s25 }
  0x56   : > { %682 = dma.done.wait (%p983_p3), %s214_s27, 128  }
  0x57   : > { %684 = vsyncadd (%p983_p3), %s214_s27, 4294967168  ;;  %p984_p4 = scmp.ne.s32.totalorder %s972_s20, 0 }
  0x59   : > { %686 = dma.done.wait (%p984_p4), [#allocation6], 256  }
  0x5a   : > { %688 = vsyncadd (%p984_p4), [#allocation6], 4294967040  ;;  %vm256_vm0 = vcmask 523264   ;;  %s246_s24 = scalar_lea.vmem [#allocation7], %s470_s25  ;;  %v721_v0 = vmov 0.0   ;;  %vm722_vm1 = vmmov 0  }
  0x5b   : > { %257 = vst.msk [vmem:[%s246_s24] sm:$0xff] %vm256_vm0, %v721_v0  ;;  %484 = vmatprep.subr.bf16.mxu0 %v721_v0  ;;  %488 = vmatprep.mubr.msk.bf16.mxu0 %vm722_vm1, %v721_v0  ;;  %v569_v1 = vld [vmem:[#allocation5] sm:$0xff]   ;;  %v570_v2 = vld [vmem:[#allocation5 + $0x8] sm:$0xff]   ;;  %v259_v3 = vld [vmem:[%s217_s4] sm:$0xff]  ;;  %vm277_vm2 = vcmask 261120   ;;  %s478_s9 = sshll.u32 %s707_s15, 7 }
  0x5c   : > { %485 = vmatpush3.bf16.msra.mxu0 %v569_v1  ;;  %v260_v4 = vpack.c.bf16 %v259_v3, %v259_v3  ;;  %v476_v11 = vld [vmem:[%s966_s2] ss:$0 sm:$0xff]  ;;  %s352_s10 = sshll.u32 %s246_s24, 4  ;;  %s914_s29 = scalar_lea.hbm %s967_s3, %s478_s9  ;;  %s916_s10 = int_to_ptr.vmem [resolvable:$true] %s352_s10 }
  0x5d   : > { %486 = vmatprep.subr.bf16.mxu0 %v721_v0  ;;  %s338_s6 = scalar_lea.sflag [#allocation4], %s893_s19  ;;  %s629_s26 = scalar_lea.vmem %s916_s10, 128 }
  0x5e   : > { %p630_p13 = scmp.ne.s32.totalorder %s916_s10, %s629_s26  ;;  %s723_s15 = smov [#allocation7]  }
  0x5f   : > { %s633_s7 = sshll.u32 %s723_s15, 4  ;;  %s634_s7 = int_to_ptr.vmem [resolvable:$false] %s633_s7 }
  0x60   : > { %487 = vmatpush3.bf16.msra.mxu0 %v570_v2  ;;  %p631_p6 = pnand %p630_p13, %p840_p10  ;;  %s635_s8 = scalar_lea.vmem %s634_s7, 256 }
  0x61   : > { %p636_p12 = scmp.lt.s32.totalorder %s916_s10, %s634_s7  ;;  %p637_p11 = scmp.lt.s32.totalorder %s635_s8, %s629_s26 }
  0x62   : > { %v258_v5 = vld [vmem:[%s246_s24] sm:$0xff]  ;;  %p632_p8 = pneg %p631_p6 }
  0x63   : > { %489 = vmatmul.mubr.msk.bf16.vlgmr.msra.gmra.mrb[0].mxu0 %vm277_vm2, %v260_v4  ;;  %p638_p0 = por %p637_p11, %p636_p12 }
  0x65   : > { %p639_p5 = pnand %p638_p0, %p632_p8 }
 0x136   : > { %v315_v6 = vpop.f32.mrb[0].mxu0 }
 0x137   : > { %v321_v7 = vadd.f32 %v315_v6, %v258_v5  ;;  %v490_v8 = vpop.f32.mrb[1].mxu0 }
 0x138   : > { %v318_v9 = vpop.f32.mrb[2].mxu0 }
 0x139   : > { %323 = vst.msk [vmem:[%s246_s24] sm:$0xff] %vm256_vm0, %v321_v7  ;;  %v491_v10 = vpop.f32.mrb[3].mxu0 }
 0x140   : > { %v327_v12 = vld [vmem:[%s246_s24] sm:$0xff] }
 0x141   : > { %v335_v13 = vadd.f32 %v476_v11, %v327_v12 }
 0x143   : > { %336 = vst.msk [vmem:[%s246_s24] sm:$0xff] %vm256_vm0, %v335_v13 }
 0x144   : > { %642 = shalt.err (!%p639_p5)
}
 0x145   : > { %s643_s21 = scalar_lea.hbm %s914_s29, 128  ;;  %s647_s27 = scalar_lea.hbm %s967_s3, 256 }
 0x146   : > { %p644_p9 = scmp.ne.s32.totalorder %s914_s29, %s643_s21  ;;  %p648_p7 = scmp.lt.u32.totalorder %s914_s29, %s967_s3 }
 0x147   : > { %p649_p3 = scmp.lt.u32.totalorder %s647_s27, %s643_s21  ;;  %p651_p13 = scmp.lt.u32.totalorder %s643_s21, %s914_s29 }
 0x148   : > { %p645_p1 = pnand %p644_p9, %p840_p10 }
 0x149   : > { %p650_p4 = por %p649_p3, %p648_p7 }
 0x14a   : > { %p646_p2 = pneg %p645_p1 }
 0x14b   : > { %p652_p6 = por %p651_p13, %p650_p4 }
 0x14d   : > { %p653_p8 = pnand %p652_p6, %p646_p2 }
 0x14f   : > { %656 = shalt.err (!%p653_p8)
}
 0x150   : > { %498 = dma.vmem_to_hbm [thread:$0]  (%p840_p10), %s916_s10, 128, %s914_s29, %s338_s6  }
 0x151 PF: > { %s364_s20 = sand.u32 1, %s695_s12   ;;  %p985_p12 = scmp.ne.s32.totalorder %s975_s23, 0 }
 0x152   : > { %p986_p11 = scmp.ge.s32.totalorder %s715_s17, 2  ;;  %s365_s22 = scalar_lea.sflag [#allocation4], %s364_s20 }
 0x154   : > { %p509_p0 = pnand %p986_p11, %p985_p12 }
 0x156   : > { %690 = dma.done.wait (!%p509_p0), %s365_s22, 128  }
 0x157   : > { %692 = vsyncadd (!%p509_p0), %s365_s22, 4294967168  ;;  %s20_s17 = sadd.s32 1, %s715_s17   ;;  %s987_s12 = smov %s699_s13 }
 0x158   : > { %p17_p5 = scmp.ge.s32.totalorder %s20_s17, 4   ;;  %s988_s13 = smov %s703_s14 }
 0x159   : > { %s989_s14 = smov %s849_s5  ;;  %s990_s15 = smov %s711_s16 }
 0x15a   : > { %s991_s16 = smov %s993_s28  ;;  %19 = sbr.rel (!%p17_p5) target bundleno = 7 (0x7), region = 93 }
 0x161   :  { %370 = vsyncpa [#allocation3], 1 }
 0x162   :  { %372 = vsyncpa [#allocation3 + $0x1], 1 }
 0x163   :  { %373 = vsyncpa [#allocation6], 1 }
 0x164   :  { %374 = vsyncpa [#allocation4], 1 }
 0x165   :  { %376 = vsyncpa [#allocation4 + $0x1], 1 }

</bundles_post_ra>
